<compile_context>
chip_gen: v6e
topology: v6e:2x2x1
jax: 0.10.0
libtpu: 0.0.40
codegen_flags: <defaults>
</compile_context>

<pallas_src>
import functools

import jax
import jax.numpy as jnp
from jax.experimental import pallas as pl
from jax.experimental.pallas import tpu as pltpu


def _round_up(x, m):
    return ((x + m - 1) // m) * m


def critic_kernel(x_ref, w1_ref, b1_ref, w2_ref, b2_ref, w3_ref, b3_ref, v_ref):
    # fc1 + ReLU  (MXU matmul, f32 accumulation)
    h1 = jnp.dot(x_ref[...], w1_ref[...], preferred_element_type=jnp.float32)
    h1 = jnp.maximum(h1 + b1_ref[...], 0.0)
    # fc2 + ReLU
    h2 = jnp.dot(h1, w2_ref[...], preferred_element_type=jnp.float32)
    h2 = jnp.maximum(h2 + b2_ref[...], 0.0)
    # V head (fc2 -> 1): VPU multiply + lane reduction; w3_ref is a (1, fc2_pad)
    # row, b3 is a scalar in SMEM.
    v = jnp.sum(h2 * w3_ref[...], axis=-1, keepdims=True) + b3_ref[0, 0]
    v_ref[...] = v.astype(v_ref.dtype)


@functools.partial(jax.jit, static_argnames=("block_b",))
def critic_forward(state, params, *, block_b=512):
    """state: (B, state_dim) f32.  params: dict with (in,out) weights, (1,out) biases."""
    B, state_dim = state.shape
    w1, b1 = params["w1"], params["b1"]
    w2, b2 = params["w2"], params["b2"]
    w3, b3 = params["w3"], params["b3"]
    fc1_dim = w1.shape[1]
    fc2_dim = w2.shape[1]

    # Lane-/sublane-aligned padded sizes.
    s_pad = _round_up(state_dim, 128)
    f1_pad = _round_up(fc1_dim, 128)
    f2_pad = _round_up(fc2_dim, 128)
    tb = min(block_b, _round_up(B, 8))          # batch tile (rows per grid step)
    b_pad = _round_up(B, tb)

    x_p = jnp.pad(state.astype(jnp.float32),
                  ((0, b_pad - B), (0, s_pad - state_dim)))
    w1_p = jnp.pad(w1, ((0, s_pad - state_dim), (0, f1_pad - fc1_dim)))
    b1_p = jnp.pad(b1, ((0, 0), (0, f1_pad - fc1_dim)))
    w2_p = jnp.pad(w2, ((0, f1_pad - fc1_dim), (0, f2_pad - fc2_dim)))
    b2_p = jnp.pad(b2, ((0, 0), (0, f2_pad - fc2_dim)))
    # Present the V-head weight as a (1, fc2_pad) row for the VPU reduction.
    w3_row = jnp.pad(w3.reshape(1, fc2_dim), ((0, 0), (0, f2_pad - fc2_dim)))
    b3_s = b3.reshape(1, 1)

    const = lambda i: (0, 0)   # weights/biases: same block every grid step (resident)

    out = pl.pallas_call(
        critic_kernel,
        out_shape=jax.ShapeDtypeStruct((b_pad, 1), jnp.float32),
        grid=(pl.cdiv(b_pad, tb),),
        in_specs=[
            pl.BlockSpec((tb, s_pad), lambda i: (i, 0)),   # state: streamed over batch
            pl.BlockSpec((s_pad, f1_pad), const),          # w1 (resident)
            pl.BlockSpec((1, f1_pad), const),              # b1
            pl.BlockSpec((f1_pad, f2_pad), const),         # w2
            pl.BlockSpec((1, f2_pad), const),              # b2
            pl.BlockSpec((1, f2_pad), const),              # w3 row
            pl.BlockSpec(memory_space=pltpu.SMEM),         # b3 scalar
        ],
        out_specs=pl.BlockSpec((tb, 1), lambda i: (i, 0)),
        compiler_params=pltpu.CompilerParams(
            dimension_semantics=("parallel",),
        ),
    )(x_p, w1_p, b1_p, w2_p, b2_p, w3_row, b3_s)

    return out[:B]


def init_params(key, state_dim, fc1_dim, fc2_dim):
    """Deterministic init mimicking PyTorch Linear default U(-1/sqrt(fan_in), +)."""
    ks = jax.random.split(key, 6)

    def lin(kw, kb, fan_in, fan_out):
        bound = 1.0 / jnp.sqrt(fan_in)
        w = jax.random.uniform(kw, (fan_in, fan_out), jnp.float32, -bound, bound)
        b = jax.random.uniform(kb, (1, fan_out), jnp.float32, -bound, bound)
        return w, b

    w1, b1 = lin(ks[0], ks[1], state_dim, fc1_dim)
    w2, b2 = lin(ks[2], ks[3], fc1_dim, fc2_dim)
    w3, b3 = lin(ks[4], ks[5], fc2_dim, 1)
    return {"w1": w1, "b1": b1, "w2": w2, "b2": b2, "w3": w3, "b3": b3}


def reference_forward(state, p):
    dot = lambda a, b: jnp.dot(a, b, precision=jax.lax.Precision.HIGHEST)
    h1 = jnp.maximum(dot(state, p["w1"]) + p["b1"], 0.0)
    h2 = jnp.maximum(dot(h1, p["w2"]) + p["b2"], 0.0)
    return dot(h2, p["w3"]) + p["b3"]


if __name__ == "__main__":
    # Small shapes consistent with the module: batch=16, state_dim=16, fc1=32, fc2=32.
    B, state_dim, fc1_dim, fc2_dim = 16, 16, 32, 32

    key = jax.random.PRNGKey(0)
    k_state, k_params = jax.random.split(key)
    state = jax.random.normal(k_state, (B, state_dim), jnp.float32)
    params = init_params(k_params, state_dim, fc1_dim, fc2_dim)

    # block_b=8 -> 2 grid steps, exercises the batch-streaming BlockSpecs.
    v = critic_forward(state, params, block_b=8)
    v = jax.block_until_ready(v)

    v_ref = reference_forward(state, params)
    assert v.shape == (B, 1), v.shape
    assert jnp.allclose(v, v_ref, atol=2e-3, rtol=2e-3), (v, v_ref)

    # TODO(synk): Adam optimizer / checkpoint save+load from the PyTorch module are
    # training/IO utilities, not part of the forward pass, and are not translated.
    print("KERNEL_OK")
</pallas_src>

<mosaic_0001>
module attributes {stable_mosaic.version = 11 : i64} {
  func.func @critic_kernel(%arg0: i32, %arg1: memref<8x128xf32, #tpu.memory_space<vmem>>, %arg2: memref<128x128xf32, #tpu.memory_space<vmem>>, %arg3: memref<1x128xf32, #tpu.memory_space<vmem>>, %arg4: memref<128x128xf32, #tpu.memory_space<vmem>>, %arg5: memref<1x128xf32, #tpu.memory_space<vmem>>, %arg6: memref<1x128xf32, #tpu.memory_space<vmem>>, %arg7: memref<1x1xf32, #tpu.memory_space<smem>>, %arg8: memref<8x1xf32, #tpu.memory_space<vmem>>) attributes {dimension_semantics = [#tpu.dimension_semantics<parallel>], iteration_bounds = array<i64: 2>, scalar_prefetch = 0 : i64, scratch_operands = 0 : i64, tpu.core_type = #tpu.core_type<tc>, window_params = [{transform_indices = @transform_0, window_bounds = array<i64: 8, 128>}, {pipeline_mode = #tpu.pipeline_mode<synchronous>, transform_indices = @transform_1, window_bounds = array<i64: 128, 128>}, {pipeline_mode = #tpu.pipeline_mode<synchronous>, transform_indices = @transform_2, window_bounds = array<i64: 1, 128>}, {pipeline_mode = #tpu.pipeline_mode<synchronous>, transform_indices = @transform_3, window_bounds = array<i64: 128, 128>}, {pipeline_mode = #tpu.pipeline_mode<synchronous>, transform_indices = @transform_4, window_bounds = array<i64: 1, 128>}, {pipeline_mode = #tpu.pipeline_mode<synchronous>, transform_indices = @transform_5, window_bounds = array<i64: 1, 128>}, {transform_indices = @transform_6, window_bounds = array<i64: 1, 1>}, {transform_indices = @transform_7, window_bounds = array<i64: 8, 1>}]} {
    %c0 = arith.constant 0 : index
    %c0_0 = arith.constant 0 : index
    %0 = vector.load %arg1[%c0, %c0_0] : memref<8x128xf32, #tpu.memory_space<vmem>>, vector<8x128xf32>
    %c0_1 = arith.constant 0 : index
    %c0_2 = arith.constant 0 : index
    %1 = vector.load %arg2[%c0_1, %c0_2] : memref<128x128xf32, #tpu.memory_space<vmem>>, vector<128x128xf32>
    %cst = arith.constant dense<0.000000e+00> : vector<8x128xf32>
    %2 = tpu.matmul %0, %1, %cst {dimension_numbers = #tpu.dot_dimension_numbers<[1], [0], [0], [1], [0, 0, 1, 1], [], []>} : vector<8x128xf32>, vector<128x128xf32>, vector<8x128xf32> -> vector<8x128xf32>
    %c0_3 = arith.constant 0 : index
    %c0_4 = arith.constant 0 : index
    %3 = vector.load %arg3[%c0_3, %c0_4] : memref<1x128xf32, #tpu.memory_space<vmem>>, vector<1x128xf32>
    %4 = vector.broadcast %3 : vector<1x128xf32> to vector<8x128xf32>
    %5 = arith.addf %2, %4 : vector<8x128xf32>
    %cst_5 = arith.constant 0.000000e+00 : f32
    %6 = vector.broadcast %cst_5 : f32 to vector<8x128xf32>
    %7 = arith.maximumf %5, %6 : vector<8x128xf32>
    %c0_6 = arith.constant 0 : index
    %c0_7 = arith.constant 0 : index
    %8 = vector.load %arg4[%c0_6, %c0_7] : memref<128x128xf32, #tpu.memory_space<vmem>>, vector<128x128xf32>
    %cst_8 = arith.constant dense<0.000000e+00> : vector<8x128xf32>
    %9 = tpu.matmul %7, %8, %cst_8 {dimension_numbers = #tpu.dot_dimension_numbers<[1], [0], [0], [1], [0, 0, 1, 1], [], []>} : vector<8x128xf32>, vector<128x128xf32>, vector<8x128xf32> -> vector<8x128xf32>
    %c0_9 = arith.constant 0 : index
    %c0_10 = arith.constant 0 : index
    %10 = vector.load %arg5[%c0_9, %c0_10] : memref<1x128xf32, #tpu.memory_space<vmem>>, vector<1x128xf32>
    %11 = vector.broadcast %10 : vector<1x128xf32> to vector<8x128xf32>
    %12 = arith.addf %9, %11 : vector<8x128xf32>
    %cst_11 = arith.constant 0.000000e+00 : f32
    %13 = vector.broadcast %cst_11 : f32 to vector<8x128xf32>
    %14 = arith.maximumf %12, %13 : vector<8x128xf32>
    %c0_12 = arith.constant 0 : index
    %c0_13 = arith.constant 0 : index
    %15 = vector.load %arg6[%c0_12, %c0_13] : memref<1x128xf32, #tpu.memory_space<vmem>>, vector<1x128xf32>
    %16 = vector.broadcast %15 : vector<1x128xf32> to vector<8x128xf32>
    %17 = arith.mulf %14, %16 : vector<8x128xf32>
    %cst_14 = arith.constant dense<0.000000e+00> : vector<8xf32>
    %18 = vector.multi_reduction <add>, %17, %cst_14 [1] : vector<8x128xf32> to vector<8xf32>
    %19 = vector.shape_cast %18 : vector<8xf32> to vector<8x1xf32>
    %c0_15 = arith.constant 0 : index
    %c0_16 = arith.constant 0 : index
    %20 = memref.load %arg7[%c0_15, %c0_16] : memref<1x1xf32, #tpu.memory_space<smem>>
    %21 = vector.broadcast %20 : f32 to vector<8x1xf32>
    %22 = arith.addf %19, %21 : vector<8x1xf32>
    %c0_17 = arith.constant 0 : index
    %c0_18 = arith.constant 0 : index
    %23 = vector.load %arg8[%c0_17, %c0_18] : memref<8x1xf32, #tpu.memory_space<vmem>>, vector<8x1xf32>
    tpu.vector_store %arg8[%c0_17, %c0_18], %22 {strides = array<i32>} : memref<8x1xf32, #tpu.memory_space<vmem>>, vector<8x1xf32>,
    return
  }
  func.func @transform_0(%arg0: i32) -> (i32, i32) {
    %c0_i32 = arith.constant 0 : i32
    %c0_i32_0 = arith.constant 0 : i32
    return %arg0, %c0_i32 : i32, i32
  }
  func.func @transform_1(%arg0: i32) -> (i32, i32) {
    %c0_i32 = arith.constant 0 : i32
    %c0_i32_0 = arith.constant 0 : i32
    %c0_i32_1 = arith.constant 0 : i32
    return %c0_i32, %c0_i32_0 : i32, i32
  }
  func.func @transform_2(%arg0: i32) -> (i32, i32) {
    %c0_i32 = arith.constant 0 : i32
    %c0_i32_0 = arith.constant 0 : i32
    %c0_i32_1 = arith.constant 0 : i32
    return %c0_i32, %c0_i32_0 : i32, i32
  }
  func.func @transform_3(%arg0: i32) -> (i32, i32) {
    %c0_i32 = arith.constant 0 : i32
    %c0_i32_0 = arith.constant 0 : i32
    %c0_i32_1 = arith.constant 0 : i32
    return %c0_i32, %c0_i32_0 : i32, i32
  }
  func.func @transform_4(%arg0: i32) -> (i32, i32) {
    %c0_i32 = arith.constant 0 : i32
    %c0_i32_0 = arith.constant 0 : i32
    %c0_i32_1 = arith.constant 0 : i32
    return %c0_i32, %c0_i32_0 : i32, i32
  }
  func.func @transform_5(%arg0: i32) -> (i32, i32) {
    %c0_i32 = arith.constant 0 : i32
    %c0_i32_0 = arith.constant 0 : i32
    %c0_i32_1 = arith.constant 0 : i32
    return %c0_i32, %c0_i32_0 : i32, i32
  }
  func.func @transform_6(%arg0: i32) -> (i32, i32) {
    %c0_i32 = arith.constant 0 : i32
    %c0_i32_0 = arith.constant 0 : i32
    %c0_i32_1 = arith.constant 0 : i32
    return %c0_i32, %c0_i32_0 : i32, i32
  }
  func.func @transform_7(%arg0: i32) -> (i32, i32) {
    %c0_i32 = arith.constant 0 : i32
    %c0_i32_0 = arith.constant 0 : i32
    return %arg0, %c0_i32 : i32, i32
  }
}

</mosaic_0001>

<bundles_post_ra>
// kernel: critic_forward.1
= control target key start
LH: loop header
LB: loop body
LE: loop exit
PB: predicated region body
PF: predicated region fallthrough
CT: control target
= control target key end

     0   :  { %s711_s26 = smov 0   ;;  %s878_s0 = inlined_call_operand.vmem [shape: f32[16,128], index: 0, kind: input, shape index: {}]   ;;  %s879_s1 = inlined_call_operand.vmem [shape: f32[128,128], index: 1, kind: input, shape index: {}]   ;;  %s880_s2 = inlined_call_operand.vmem [shape: f32[1,128], index: 2, kind: input, shape index: {}]   ;;  %s881_s3 = inlined_call_operand.vmem [shape: f32[128,128], index: 3, kind: input, shape index: {}]   ;;  %s882_s4 = inlined_call_operand.vmem [shape: f32[1,128], index: 4, kind: input, shape index: {}]   ;;  %s883_s5 = inlined_call_operand.vmem [shape: f32[1,128], index: 5, kind: input, shape index: {}]   ;;  %s884_s6 = inlined_call_operand.<no memory space> [shape: f32[1,1], index: 6, kind: input, shape index: {}]   ;;  %s885_s7 = inlined_call_operand.vmem [shape: f32[16,1], index: 7, kind: output, shape index: {}]  }
   0x1   :  { %12 = sst [smem:[#allocation2]] %s884_s6 }
   0x2 LB: > { %s532_s27 = sadd.s32 4294967295, %s664_s26   ;;  %p536_p0 = scmp.ge.s32.totalorder %s664_s26, 1  ;;  %s664_s26 = sphi %s711_s26, %s18_s26  }
   0x3   : > { %p237_p1 = scmp.lt.s32.totalorder %s664_s26, 3 }
   0x5   : > { %p238_p2 = pnand %p536_p0, %p237_p1 }
   0x6   : > { %p267_p3 = scmp.lt.s32.totalorder (!%p238_p2), %s532_s27, 1  ;;  %s474_s13 = sld [smem:[#allocation2]] (!%p238_p2) }
   0x7   : > { %241 = sbr.rel (%p238_p2) target bundleno = 582 (0x246), region = 48 }
   0xc   : > { %v291_v0 = vld [vmem:[%s879_s1 + $0x78] sm:$0xff]  ;;  %v666_v1 = vmov 0.0   ;;  %v290_v2 = vld [vmem:[%s879_s1 + $0x70] sm:$0xff]  ;;  %vm667_vm0 = vmmov 0   ;;  %v289_v3 = vld [vmem:[%s879_s1 + $0x68] sm:$0xff]  ;;  %s887_s27 = smov (!%p267_p3, %s532_s27), 1  ;;  %v475_v46 = vstv %s474_s13 }
   0xd   : > { %578 = vmatprep.subr.mxu0 %v666_v1  ;;  %610 = vmatprep.mubr.msk.f32.mxu0 %vm667_vm0, %v666_v1  ;;  %v288_v4 = vld [vmem:[%s879_s1 + $0x60] sm:$0xff]  ;;  %v385_v5 = vld [vmem:[%s881_s3 + $0x78] sm:$0xff]  ;;  %v384_v6 = vld [vmem:[%s881_s3 + $0x70] sm:$0xff]  ;;  %s537_s8 = sshll.u32 %s887_s27, 3  ;;  %vm477_vm1 = vcmask 7168  }
   0xe   : > { %579 = vmatpush3.msra.mxu0 %v291_v0  ;;  %613 = vmatprep.subr.mxu1 %v666_v1  ;;  %v287_v7 = vld [vmem:[%s879_s1 + $0x58] sm:$0xff]  ;;  %v383_v8 = vld [vmem:[%s881_s3 + $0x68] sm:$0xff]  ;;  %v286_v9 = vld [vmem:[%s879_s1 + $0x50] sm:$0xff]  ;;  %s270_s17 = scalar_lea.vmem %s878_s0, %s537_s8  ;;  %s274_s16 = scalar_lea.vmem %s885_s7, %s537_s8 }
   0xf   : > { %580 = vmatprep.subr.mxu0 %v666_v1  ;;  %645 = vmatprep.mubr.msk.f32.mxu1 %vm667_vm0, %v666_v1  ;;  %v382_v10 = vld [vmem:[%s881_s3 + $0x60] sm:$0xff]  ;;  %v285_v11 = vld [vmem:[%s879_s1 + $0x48] sm:$0xff]  ;;  %v381_v12 = vld [vmem:[%s881_s3 + $0x58] sm:$0xff] }
  0x10   : > { %581 = vmatpush3.msra.mxu0 %v290_v2  ;;  %614 = vmatpush3.msra.mxu1 %v385_v5  ;;  %v284_v13 = vld [vmem:[%s879_s1 + $0x40] sm:$0xff]  ;;  %v380_v14 = vld [vmem:[%s881_s3 + $0x50] sm:$0xff]  ;;  %v283_v15 = vld [vmem:[%s879_s1 + $0x38] sm:$0xff] }
  0x11   : > { %582 = vmatprep.subr.mxu0 %v666_v1  ;;  %615 = vmatprep.subr.mxu1 %v666_v1  ;;  %v379_v16 = vld [vmem:[%s881_s3 + $0x48] sm:$0xff]  ;;  %v282_v17 = vld [vmem:[%s879_s1 + $0x30] sm:$0xff]  ;;  %v378_v18 = vld [vmem:[%s881_s3 + $0x40] sm:$0xff] }
  0x12   : > { %583 = vmatpush3.msra.mxu0 %v289_v3  ;;  %616 = vmatpush3.msra.mxu1 %v384_v6  ;;  %v281_v19 = vld [vmem:[%s879_s1 + $0x28] sm:$0xff]  ;;  %v377_v20 = vld [vmem:[%s881_s3 + $0x38] sm:$0xff]  ;;  %v280_v21 = vld [vmem:[%s879_s1 + $0x20] sm:$0xff] }
  0x13   : > { %584 = vmatprep.subr.mxu0 %v666_v1  ;;  %617 = vmatprep.subr.mxu1 %v666_v1  ;;  %v376_v22 = vld [vmem:[%s881_s3 + $0x30] sm:$0xff]  ;;  %v279_v23 = vld [vmem:[%s879_s1 + $0x18] sm:$0xff]  ;;  %v375_v24 = vld [vmem:[%s881_s3 + $0x28] sm:$0xff] }
  0x14   : > { %585 = vmatpush3.msra.mxu0 %v288_v4  ;;  %618 = vmatpush3.msra.mxu1 %v383_v8  ;;  %v278_v25 = vld [vmem:[%s879_s1 + $0x10] sm:$0xff]  ;;  %v374_v26 = vld [vmem:[%s881_s3 + $0x20] sm:$0xff]  ;;  %v277_v27 = vld [vmem:[%s879_s1 + $0x8] sm:$0xff] }
  0x15   : > { %586 = vmatprep.subr.mxu0 %v666_v1  ;;  %619 = vmatprep.subr.mxu1 %v666_v1  ;;  %v373_v28 = vld [vmem:[%s881_s3 + $0x18] sm:$0xff]  ;;  %v276_v29 = vld [vmem:[%s879_s1] sm:$0xff]  ;;  %v372_v31 = vld [vmem:[%s881_s3 + $0x10] sm:$0xff] }
  0x16   : > { %587 = vmatpush3.msra.mxu0 %v287_v7  ;;  %620 = vmatpush3.msra.mxu1 %v382_v10  ;;  %v275_v30 = vld [vmem:[%s270_s17] sm:$0xff]  ;;  %v371_v32 = vld [vmem:[%s881_s3 + $0x8] sm:$0xff] }
  0x17   : > { %588 = vmatprep.subr.mxu0 %v666_v1  ;;  %621 = vmatprep.subr.mxu1 %v666_v1  ;;  %v370_v33 = vld [vmem:[%s881_s3] sm:$0xff] }
  0x18   : > { %589 = vmatpush3.msra.mxu0 %v286_v9  ;;  %622 = vmatpush3.msra.mxu1 %v381_v12  ;;  %v539_v34 = vld [vmem:[%s880_s2] ss:$0 sm:$0xff] }
  0x19   : > { %590 = vmatprep.subr.mxu0 %v666_v1  ;;  %623 = vmatprep.subr.mxu1 %v666_v1  ;;  %v540_v39 = vld [vmem:[%s882_s4] ss:$0 sm:$0xff] }
  0x1a   : > { %591 = vmatpush3.msra.mxu0 %v285_v11  ;;  %624 = vmatpush3.msra.mxu1 %v380_v14  ;;  %v541_v43 = vld [vmem:[%s883_s5] ss:$0 sm:$0xff] }
  0x1b   : > { %592 = vmatprep.subr.mxu0 %v666_v1  ;;  %625 = vmatprep.subr.mxu1 %v666_v1 }
  0x1c   : > { %593 = vmatpush3.msra.mxu0 %v284_v13  ;;  %626 = vmatpush3.msra.mxu1 %v379_v16 }
  0x1d   : > { %594 = vmatprep.subr.mxu0 %v666_v1  ;;  %627 = vmatprep.subr.mxu1 %v666_v1 }
  0x1e   : > { %595 = vmatpush3.msra.mxu0 %v283_v15  ;;  %628 = vmatpush3.msra.mxu1 %v378_v18 }
  0x1f   : > { %596 = vmatprep.subr.mxu0 %v666_v1  ;;  %629 = vmatprep.subr.mxu1 %v666_v1 }
  0x20   : > { %597 = vmatpush3.msra.mxu0 %v282_v17  ;;  %630 = vmatpush3.msra.mxu1 %v377_v20 }
  0x21   : > { %598 = vmatprep.subr.mxu0 %v666_v1  ;;  %631 = vmatprep.subr.mxu1 %v666_v1 }
  0x22   : > { %599 = vmatpush3.msra.mxu0 %v281_v19  ;;  %632 = vmatpush3.msra.mxu1 %v376_v22 }
  0x23   : > { %600 = vmatprep.subr.mxu0 %v666_v1  ;;  %633 = vmatprep.subr.mxu1 %v666_v1 }
  0x24   : > { %601 = vmatpush3.msra.mxu0 %v280_v21  ;;  %634 = vmatpush3.msra.mxu1 %v375_v24 }
  0x25   : > { %602 = vmatprep.subr.mxu0 %v666_v1  ;;  %635 = vmatprep.subr.mxu1 %v666_v1 }
  0x26   : > { %603 = vmatpush3.msra.mxu0 %v279_v23  ;;  %636 = vmatpush3.msra.mxu1 %v374_v26 }
  0x27   : > { %604 = vmatprep.subr.mxu0 %v666_v1  ;;  %637 = vmatprep.subr.mxu1 %v666_v1 }
  0x28   : > { %605 = vmatpush3.msra.mxu0 %v278_v25  ;;  %638 = vmatpush3.msra.mxu1 %v373_v28 }
  0x29   : > { %606 = vmatprep.subr.mxu0 %v666_v1  ;;  %639 = vmatprep.subr.mxu1 %v666_v1 }
  0x2a   : > { %607 = vmatpush3.msra.mxu0 %v277_v27  ;;  %640 = vmatpush3.msra.mxu1 %v372_v31 }
  0x2b   : > { %608 = vmatprep.subr.mxu0 %v666_v1  ;;  %641 = vmatprep.subr.mxu1 %v666_v1 }
  0x2c   : > { %609 = vmatpush3.msra.mxu0 %v276_v29  ;;  %642 = vmatpush3.msra.mxu1 %v371_v32 }
  0x2d   : > { %611 = vmatmul.mubr.f32.vlgmr.msra.gmra.mxu0 %v275_v30  ;;  %643 = vmatprep.subr.mxu1 %v666_v1 }
  0x2e   : > { %644 = vmatpush3.msra.mxu1 %v370_v33 }
  0xed   : > { %v365_v35 = vpop.f32.mrf.mxu0 }
  0xee   : > { %v366_v36 = vadd.f32 %v539_v34, %v365_v35 }
  0xef   : > { %v612_v37 = vpop.f32.mrf.mxu0 }
  0xf0   : > { %v369_v38 = vmax.f32 %v366_v36, 0.0 }
  0xf2   : > { %646 = vmatmul.mubr.f32.vlgmr.msra.gmra.mxu1 %v369_v38 }
 0x1b2   : > { %v459_v40 = vpop.f32.mrf.mxu1 }
 0x1b3   : > { %v460_v41 = vadd.f32 %v540_v39, %v459_v40 }
 0x1b4   : > { %v647_v42 = vpop.f32.mrf.mxu1 }
 0x1b5   : > { %v463_v44 = vmax.f32 %v460_v41, 0.0 }
 0x1b7   : > { %v471_v45 = vmul.f32 %v541_v43, %v463_v44 }
 0x1b9   : > { %472 = vadd.xlane.f32.xlu0 %v471_v45 }
 0x242   : > { %v473_v47 = vpop.xlane.xlu0 %472 }
 0x243   : > { %v476_v48 = vadd.f32 %v475_v46, %v473_v47 }
 0x245   : > { %478 = vst.msk [vmem:[%s274_s16] sm:$0xff] %vm477_vm1, %v476_v48 }
 0x246 PF: > { %s18_s26 = sadd.s32 1, %s664_s26  }
 0x247   : > { %p15_p4 = scmp.ge.s32.totalorder %s18_s26, 4  }
 0x249   :  { %17 = sbr.rel (!%p15_p4) target bundleno = 2 (0x2), region = 78 }

</bundles_post_ra>
